<compile_context>
chip_gen: v6e
topology: v6e:2x2x1
jax: 0.10.0
libtpu: 0.0.40
codegen_flags: <defaults>
</compile_context>

<pallas_src>
import functools

import jax
import jax.numpy as jnp
from jax import lax
from jax.experimental import pallas as pl
from jax.experimental.pallas import tpu as pltpu


def _bisenet_output_kernel(x_ref, w1_ref, bias_ref, w2_ref, b2_ref, mask_ref,
                           o_ref, *scratch, width, use_scratch):
    # x_ref:    (G, Ck, Lp)      flattened, height+linearly padded images (lane-major)
    # w1_ref:   (Cmid, 9*Ck)     BN-scale-folded 3x3 weights, tap-major along K
    # bias_ref: (Cmid, 1)        folded BN bias
    # w2_ref:   (Ncls, Cmid)     1x1 conv weight
    # b2_ref:   (Ncls, 1)        1x1 conv bias
    # mask_ref: (2, G*HW)        [0]=not-left-edge, [1]=not-right-edge (tiled/image)
    # o_ref:    (1, Ncls, G*HW)  lane-dense output
    # scratch:  optional (9*Ck, G*HW) VMEM im2col staging buffer (production path)
    col_ref = scratch[0] if use_scratch else None
    g, ck, _ = x_ref.shape
    ghw = o_ref.shape[2]
    hw = ghw // g

    # Build im2col: tap (ty, tx) is a pure lane shift of ty*W + tx on each image's
    # flattened (H+2, W) plane; column wrap at the image edges is zeroed by masks.
    rows = []
    for ty in range(3):
        for tx in range(3):
            t = ty * 3 + tx
            s = ty * width + tx
            parts = [x_ref[j, :, s:s + hw] for j in range(g)]          # (Ck, HW) each
            row = parts[0] if g == 1 else jnp.concatenate(parts, axis=1)  # (Ck, G*HW)
            if tx == 0:
                row = row * mask_ref[0:1, :]
            elif tx == 2:
                row = row * mask_ref[1:2, :]
            if use_scratch:
                # Ck is sublane-aligned -> full-tile, aligned store.
                col_ref[t * ck:(t + 1) * ck, :] = row
            else:
                rows.append(row)

    col = col_ref[...] if use_scratch else jnp.concatenate(rows, axis=0)  # (9*Ck, G*HW)

    # 3x3 conv (+ folded BN scale) as one K = 9*Ck matmul, then BN bias + ReLU in f32.
    h = jnp.dot(w1_ref[...], col, preferred_element_type=jnp.float32)
    h = jnp.maximum(h + bias_ref[...], 0.0)                               # (Cmid, G*HW)

    # 1x1 conv with bias; lane-dense store.
    out = jnp.dot(w2_ref[...], h.astype(w2_ref.dtype),
                  preferred_element_type=jnp.float32) + b2_ref[...]
    o_ref[0] = out.astype(o_ref.dtype)


def bisenet_output_pallas(x_nchw, w1_oihw, bn_gamma, bn_beta, bn_mean, bn_var,
                          w2_oihw, b2, eps=1e-5, compute_dtype=jnp.float32,
                          images_per_step=None, use_scratch=None):
    """BiSeNetOutput.forward. x_nchw: (N, Cin, H, W). Returns (N, Ncls, H, W) f32."""
    N, Cin, H, W = x_nchw.shape
    Cmid = w1_oihw.shape[0]
    Ncls = w2_oihw.shape[0]
    HW = H * W

    # Lane-group size: by default fold the whole batch into the lane axis -> one grid
    # step (best on single-TC v5e/v6e).  On v7x pass images_per_step=N//2 so the
    # "parallel" grid axis has >=2 steps and both TensorCores get work.
    if images_per_step is None:
        images_per_step = N
    G = images_per_step
    assert N % G == 0, "images_per_step must divide the batch"
    steps = N // G
    GHW = G * HW

    itemsize = jnp.dtype(compute_dtype).itemsize
    sub = 32 // itemsize                      # sublane tile: 8 for f32, 16 for bf16
    if use_scratch is None:
        # Register-resident im2col while the whole block fits comfortably in vregs;
        # otherwise stage through a sublane-aligned VMEM scratch.
        use_scratch = 9 * Cin * GHW * itemsize > 96 * 1024
    cin_k = (-(-Cin // sub) * sub) if use_scratch else Cin   # K-channels per tap

    # Channel pad (scratch path only): keeps every tap slab a full, aligned store.
    x_c = x_nchw if cin_k == Cin else jnp.pad(
        x_nchw, ((0, 0), (0, cin_k - Cin), (0, 0), (0, 0)))

    # Lane-major flattened image: pad H by 1 row each side, flatten (H+2, W), pad the
    # flat axis by 1 in front (so every 3x3 tap is a constant non-negative lane shift)
    # and up to a multiple of 128 lanes at the back.
    # TODO(synk): for production shapes build the halo in-kernel from raw NCHW row
    # bands instead of materialising this padded copy in HBM.
    L = (H + 2) * W + 2
    Lp = -(-L // 128) * 128
    x_pad = jnp.pad(x_c, ((0, 0), (0, 0), (1, 1), (0, 0)))
    x_lin = jnp.pad(x_pad.reshape(N, cin_k, (H + 2) * W),
                    ((0, 0), (0, 0), (1, Lp - L + 1))).astype(compute_dtype)

    # Fold eval-mode BatchNorm (running stats) into the 3x3 weights, in f32, cast once.
    scale = bn_gamma / jnp.sqrt(bn_var + eps)
    bias = (bn_beta - bn_mean * scale).astype(jnp.float32).reshape(Cmid, 1)
    w1 = jnp.transpose(w1_oihw, (0, 2, 3, 1))                 # (Cmid, 3, 3, Cin)
    if cin_k != Cin:
        w1 = jnp.pad(w1, ((0, 0), (0, 0), (0, 0), (0, cin_k - Cin)))
    w1 = (w1.reshape(Cmid, 9 * cin_k) * scale[:, None]).astype(compute_dtype)

    w2 = w2_oihw.reshape(Ncls, Cmid).astype(compute_dtype)
    b2r = b2.astype(jnp.float32).reshape(Ncls, 1)

    # Column-wrap masks (left / right image edge), tiled across the lane group.
    cols = jnp.arange(HW, dtype=jnp.int32) % W
    m = jnp.stack([(cols != 0), (cols != W - 1)]).astype(compute_dtype)   # (2, HW)
    masks = jnp.tile(m, (1, G))                                           # (2, G*HW)

    kernel = functools.partial(_bisenet_output_kernel, width=W,
                               use_scratch=use_scratch)
    scratch_shapes = ([pltpu.VMEM((9 * cin_k, GHW), compute_dtype)]
                      if use_scratch else [])

    # Weight/bias/mask index_maps are constant so they stay VMEM-resident across steps.
    out_flat = pl.pallas_call(
        kernel,
        out_shape=jax.ShapeDtypeStruct((steps, Ncls, GHW), jnp.float32),
        grid_spec=pltpu.PrefetchScalarGridSpec(
            num_scalar_prefetch=0,
            grid=(steps,),
            in_specs=[
                pl.BlockSpec((G, cin_k, Lp), lambda s: (s, 0, 0)),
                pl.BlockSpec((Cmid, 9 * cin_k), lambda s: (0, 0)),
                pl.BlockSpec((Cmid, 1), lambda s: (0, 0)),
                pl.BlockSpec((Ncls, Cmid), lambda s: (0, 0)),
                pl.BlockSpec((Ncls, 1), lambda s: (0, 0)),
                pl.BlockSpec((2, GHW), lambda s: (0, 0)),
            ],
            out_specs=pl.BlockSpec((1, Ncls, GHW), lambda s: (s, 0, 0)),
            scratch_shapes=scratch_shapes,
        ),
        compiler_params=pltpu.CompilerParams(
            dimension_semantics=("parallel",)),
    )(x_lin, w1, bias, w2, b2r, masks)

    # Lanes within a step are ordered [image-in-group, pixel]; un-interleave to NCHW.
    out = out_flat.reshape(steps, Ncls, G, H, W).transpose(0, 2, 1, 3, 4)
    return out.reshape(N, Ncls, H, W)


def _reference(x, w1, gamma, beta, mean, var, w2, b2, eps=1e-5):
    y = lax.conv_general_dilated(
        x, w1, window_strides=(1, 1), padding=((1, 1), (1, 1)),
        dimension_numbers=("NCHW", "OIHW", "NCHW"))
    scale = gamma / jnp.sqrt(var + eps)
    y = y * scale[None, :, None, None] + (beta - mean * scale)[None, :, None, None]
    y = jnp.maximum(y, 0.0)
    y = lax.conv_general_dilated(
        y, w2, window_strides=(1, 1), padding=((0, 0), (0, 0)),
        dimension_numbers=("NCHW", "OIHW", "NCHW"))
    return y + b2[None, :, None, None]


if __name__ == "__main__":
    # Small, PyTorch-consistent shapes: N=2, in_chan=4, mid_chan=16, n_classes=4, H=W=16
    N, Cin, H, W = 2, 4, 16, 16
    Cmid, Ncls = 16, 4

    key = jax.random.PRNGKey(0)
    kx, kw1, kw2, kg, kb, km, kv = jax.random.split(key, 7)

    x = jax.random.normal(kx, (N, Cin, H, W), dtype=jnp.float32)

    # kaiming_normal_(a=1): gain = sqrt(2/(1+1)) = 1, std = 1/sqrt(fan_in)
    w1 = jax.random.normal(kw1, (Cmid, Cin, 3, 3), jnp.float32) / jnp.sqrt(Cin * 9.0)
    w2 = jax.random.normal(kw2, (Ncls, Cmid, 1, 1), jnp.float32) / jnp.sqrt(Cmid * 1.0)
    b2 = jnp.zeros((Ncls,), jnp.float32)  # init_weight: constant_(bias, 0)

    # Eval-mode BatchNorm affine + running stats (non-trivial, to exercise the fold).
    gamma = jax.random.uniform(kg, (Cmid,), jnp.float32, 0.5, 1.5)
    beta = 0.1 * jax.random.normal(kb, (Cmid,), jnp.float32)
    mean = 0.1 * jax.random.normal(km, (Cmid,), jnp.float32)
    var = jax.random.uniform(kv, (Cmid,), jnp.float32, 0.5, 1.5)

    ref = _reference(x, w1, gamma, beta, mean, var, w2, b2)

    # 1) Default: batch folded into lanes, single grid step, register-resident im2col
    #    (best on single-TC v5e / v6e).
    out = jax.block_until_ready(
        bisenet_output_pallas(x, w1, gamma, beta, mean, var, w2, b2))
    assert out.shape == (N, Ncls, H, W)
    assert jnp.allclose(out, ref, atol=2e-4, rtol=2e-4), "mismatch (batch-in-lanes)"

    # 2) v7x-style config: grid=(N,) "parallel" so both TensorCores get work.
    out_grid = jax.block_until_ready(
        bisenet_output_pallas(x, w1, gamma, beta, mean, var, w2, b2,
                              images_per_step=1))
    assert jnp.allclose(out_grid, ref, atol=2e-4, rtol=2e-4), "mismatch (grid=(N,))"

    # 3) Production-style path: sublane-aligned VMEM im2col scratch (Cin padded to 8).
    out_scr = jax.block_until_ready(
        bisenet_output_pallas(x, w1, gamma, beta, mean, var, w2, b2,
                              use_scratch=True))
    assert jnp.allclose(out_scr, ref, atol=2e-4, rtol=2e-4), "mismatch (scratch path)"

    print("KERNEL_OK")
</pallas_src>

<mosaic_0001>
module attributes {stable_mosaic.version = 11 : i64} {
  func.func @_bisenet_output_kernel(%arg0: i32, %arg1: memref<2x4x384xf32, #tpu.memory_space<vmem>>, %arg2: memref<16x36xf32, #tpu.memory_space<vmem>>, %arg3: memref<16x1xf32, #tpu.memory_space<vmem>>, %arg4: memref<4x16xf32, #tpu.memory_space<vmem>>, %arg5: memref<4x1xf32, #tpu.memory_space<vmem>>, %arg6: memref<2x512xf32, #tpu.memory_space<vmem>>, %arg7: memref<1x4x512xf32, #tpu.memory_space<vmem>>) attributes {dimension_semantics = [#tpu.dimension_semantics<parallel>], iteration_bounds = array<i64: 1>, scalar_prefetch = 0 : i64, scratch_operands = 0 : i64, tpu.core_type = #tpu.core_type<tc>, window_params = [{transform_indices = @transform_0, window_bounds = array<i64: 2, 4, 384>}, {pipeline_mode = #tpu.pipeline_mode<synchronous>, transform_indices = @transform_1, window_bounds = array<i64: 16, 36>}, {pipeline_mode = #tpu.pipeline_mode<synchronous>, transform_indices = @transform_2, window_bounds = array<i64: 16, 1>}, {pipeline_mode = #tpu.pipeline_mode<synchronous>, transform_indices = @transform_3, window_bounds = array<i64: 4, 16>}, {pipeline_mode = #tpu.pipeline_mode<synchronous>, transform_indices = @transform_4, window_bounds = array<i64: 4, 1>}, {pipeline_mode = #tpu.pipeline_mode<synchronous>, transform_indices = @transform_5, window_bounds = array<i64: 2, 512>}, {transform_indices = @transform_6, window_bounds = array<i64: 1, 4, 512>}]} {
    %c0 = arith.constant 0 : index
    %c0_0 = arith.constant 0 : index
    %c0_1 = arith.constant 0 : index
    %0 = vector.load %arg1[%c0, %c0_0, %c0_1] : memref<2x4x384xf32, #tpu.memory_space<vmem>>, vector<1x4x256xf32>
    %1 = vector.shape_cast %0 : vector<1x4x256xf32> to vector<4x256xf32>
    %c1 = arith.constant 1 : index
    %c0_2 = arith.constant 0 : index
    %c0_3 = arith.constant 0 : index
    %2 = vector.load %arg1[%c1, %c0_2, %c0_3] : memref<2x4x384xf32, #tpu.memory_space<vmem>>, vector<1x4x256xf32>
    %3 = vector.shape_cast %2 : vector<1x4x256xf32> to vector<4x256xf32>
    %4 = tpu.concatenate %1, %3 in 1 : vector<4x256xf32>, vector<4x256xf32> -> vector<4x512xf32>
    %c0_4 = arith.constant 0 : index
    %c0_5 = arith.constant 0 : index
    %5 = vector.load %arg6[%c0_4, %c0_5] : memref<2x512xf32, #tpu.memory_space<vmem>>, vector<1x512xf32>
    %6 = vector.broadcast %5 : vector<1x512xf32> to vector<4x512xf32>
    %7 = arith.mulf %4, %6 : vector<4x512xf32>
    %c0_6 = arith.constant 0 : index
    %c0_7 = arith.constant 0 : index
    %c1_8 = arith.constant 1 : index
    %8 = vector.load %arg1[%c0_6, %c0_7, %c1_8] : memref<2x4x384xf32, #tpu.memory_space<vmem>>, vector<1x4x256xf32>
    %9 = vector.shape_cast %8 : vector<1x4x256xf32> to vector<4x256xf32>
    %c1_9 = arith.constant 1 : index
    %c0_10 = arith.constant 0 : index
    %c1_11 = arith.constant 1 : index
    %10 = vector.load %arg1[%c1_9, %c0_10, %c1_11] : memref<2x4x384xf32, #tpu.memory_space<vmem>>, vector<1x4x256xf32>
    %11 = vector.shape_cast %10 : vector<1x4x256xf32> to vector<4x256xf32>
    %12 = tpu.concatenate %9, %11 in 1 : vector<4x256xf32>, vector<4x256xf32> -> vector<4x512xf32>
    %c0_12 = arith.constant 0 : index
    %c0_13 = arith.constant 0 : index
    %c2 = arith.constant 2 : index
    %13 = vector.load %arg1[%c0_12, %c0_13, %c2] : memref<2x4x384xf32, #tpu.memory_space<vmem>>, vector<1x4x256xf32>
    %14 = vector.shape_cast %13 : vector<1x4x256xf32> to vector<4x256xf32>
    %c1_14 = arith.constant 1 : index
    %c0_15 = arith.constant 0 : index
    %c2_16 = arith.constant 2 : index
    %15 = vector.load %arg1[%c1_14, %c0_15, %c2_16] : memref<2x4x384xf32, #tpu.memory_space<vmem>>, vector<1x4x256xf32>
    %16 = vector.shape_cast %15 : vector<1x4x256xf32> to vector<4x256xf32>
    %17 = tpu.concatenate %14, %16 in 1 : vector<4x256xf32>, vector<4x256xf32> -> vector<4x512xf32>
    %c1_17 = arith.constant 1 : index
    %c0_18 = arith.constant 0 : index
    %18 = vector.load %arg6[%c1_17, %c0_18] : memref<2x512xf32, #tpu.memory_space<vmem>>, vector<1x512xf32>
    %19 = vector.broadcast %18 : vector<1x512xf32> to vector<4x512xf32>
    %20 = arith.mulf %17, %19 : vector<4x512xf32>
    %c0_19 = arith.constant 0 : index
    %c0_20 = arith.constant 0 : index
    %c16 = arith.constant 16 : index
    %21 = vector.load %arg1[%c0_19, %c0_20, %c16] : memref<2x4x384xf32, #tpu.memory_space<vmem>>, vector<1x4x256xf32>
    %22 = vector.shape_cast %21 : vector<1x4x256xf32> to vector<4x256xf32>
    %c1_21 = arith.constant 1 : index
    %c0_22 = arith.constant 0 : index
    %c16_23 = arith.constant 16 : index
    %23 = vector.load %arg1[%c1_21, %c0_22, %c16_23] : memref<2x4x384xf32, #tpu.memory_space<vmem>>, vector<1x4x256xf32>
    %24 = vector.shape_cast %23 : vector<1x4x256xf32> to vector<4x256xf32>
    %25 = tpu.concatenate %22, %24 in 1 : vector<4x256xf32>, vector<4x256xf32> -> vector<4x512xf32>
    %c0_24 = arith.constant 0 : index
    %c0_25 = arith.constant 0 : index
    %26 = vector.load %arg6[%c0_24, %c0_25] : memref<2x512xf32, #tpu.memory_space<vmem>>, vector<1x512xf32>
    %27 = vector.broadcast %26 : vector<1x512xf32> to vector<4x512xf32>
    %28 = arith.mulf %25, %27 : vector<4x512xf32>
    %c0_26 = arith.constant 0 : index
    %c0_27 = arith.constant 0 : index
    %c17 = arith.constant 17 : index
    %29 = vector.load %arg1[%c0_26, %c0_27, %c17] : memref<2x4x384xf32, #tpu.memory_space<vmem>>, vector<1x4x256xf32>
    %30 = vector.shape_cast %29 : vector<1x4x256xf32> to vector<4x256xf32>
    %c1_28 = arith.constant 1 : index
    %c0_29 = arith.constant 0 : index
    %c17_30 = arith.constant 17 : index
    %31 = vector.load %arg1[%c1_28, %c0_29, %c17_30] : memref<2x4x384xf32, #tpu.memory_space<vmem>>, vector<1x4x256xf32>
    %32 = vector.shape_cast %31 : vector<1x4x256xf32> to vector<4x256xf32>
    %33 = tpu.concatenate %30, %32 in 1 : vector<4x256xf32>, vector<4x256xf32> -> vector<4x512xf32>
    %c0_31 = arith.constant 0 : index
    %c0_32 = arith.constant 0 : index
    %c18 = arith.constant 18 : index
    %34 = vector.load %arg1[%c0_31, %c0_32, %c18] : memref<2x4x384xf32, #tpu.memory_space<vmem>>, vector<1x4x256xf32>
    %35 = vector.shape_cast %34 : vector<1x4x256xf32> to vector<4x256xf32>
    %c1_33 = arith.constant 1 : index
    %c0_34 = arith.constant 0 : index
    %c18_35 = arith.constant 18 : index
    %36 = vector.load %arg1[%c1_33, %c0_34, %c18_35] : memref<2x4x384xf32, #tpu.memory_space<vmem>>, vector<1x4x256xf32>
    %37 = vector.shape_cast %36 : vector<1x4x256xf32> to vector<4x256xf32>
    %38 = tpu.concatenate %35, %37 in 1 : vector<4x256xf32>, vector<4x256xf32> -> vector<4x512xf32>
    %c1_36 = arith.constant 1 : index
    %c0_37 = arith.constant 0 : index
    %39 = vector.load %arg6[%c1_36, %c0_37] : memref<2x512xf32, #tpu.memory_space<vmem>>, vector<1x512xf32>
    %40 = vector.broadcast %39 : vector<1x512xf32> to vector<4x512xf32>
    %41 = arith.mulf %38, %40 : vector<4x512xf32>
    %c0_38 = arith.constant 0 : index
    %c0_39 = arith.constant 0 : index
    %c32 = arith.constant 32 : index
    %42 = vector.load %arg1[%c0_38, %c0_39, %c32] : memref<2x4x384xf32, #tpu.memory_space<vmem>>, vector<1x4x256xf32>
    %43 = vector.shape_cast %42 : vector<1x4x256xf32> to vector<4x256xf32>
    %c1_40 = arith.constant 1 : index
    %c0_41 = arith.constant 0 : index
    %c32_42 = arith.constant 32 : index
    %44 = vector.load %arg1[%c1_40, %c0_41, %c32_42] : memref<2x4x384xf32, #tpu.memory_space<vmem>>, vector<1x4x256xf32>
    %45 = vector.shape_cast %44 : vector<1x4x256xf32> to vector<4x256xf32>
    %46 = tpu.concatenate %43, %45 in 1 : vector<4x256xf32>, vector<4x256xf32> -> vector<4x512xf32>
    %c0_43 = arith.constant 0 : index
    %c0_44 = arith.constant 0 : index
    %47 = vector.load %arg6[%c0_43, %c0_44] : memref<2x512xf32, #tpu.memory_space<vmem>>, vector<1x512xf32>
    %48 = vector.broadcast %47 : vector<1x512xf32> to vector<4x512xf32>
    %49 = arith.mulf %46, %48 : vector<4x512xf32>
    %c0_45 = arith.constant 0 : index
    %c0_46 = arith.constant 0 : index
    %c33 = arith.constant 33 : index
    %50 = vector.load %arg1[%c0_45, %c0_46, %c33] : memref<2x4x384xf32, #tpu.memory_space<vmem>>, vector<1x4x256xf32>
    %51 = vector.shape_cast %50 : vector<1x4x256xf32> to vector<4x256xf32>
    %c1_47 = arith.constant 1 : index
    %c0_48 = arith.constant 0 : index
    %c33_49 = arith.constant 33 : index
    %52 = vector.load %arg1[%c1_47, %c0_48, %c33_49] : memref<2x4x384xf32, #tpu.memory_space<vmem>>, vector<1x4x256xf32>
    %53 = vector.shape_cast %52 : vector<1x4x256xf32> to vector<4x256xf32>
    %54 = tpu.concatenate %51, %53 in 1 : vector<4x256xf32>, vector<4x256xf32> -> vector<4x512xf32>
    %c0_50 = arith.constant 0 : index
    %c0_51 = arith.constant 0 : index
    %c34 = arith.constant 34 : index
    %55 = vector.load %arg1[%c0_50, %c0_51, %c34] : memref<2x4x384xf32, #tpu.memory_space<vmem>>, vector<1x4x256xf32>
    %56 = vector.shape_cast %55 : vector<1x4x256xf32> to vector<4x256xf32>
    %c1_52 = arith.constant 1 : index
    %c0_53 = arith.constant 0 : index
    %c34_54 = arith.constant 34 : index
    %57 = vector.load %arg1[%c1_52, %c0_53, %c34_54] : memref<2x4x384xf32, #tpu.memory_space<vmem>>, vector<1x4x256xf32>
    %58 = vector.shape_cast %57 : vector<1x4x256xf32> to vector<4x256xf32>
    %59 = tpu.concatenate %56, %58 in 1 : vector<4x256xf32>, vector<4x256xf32> -> vector<4x512xf32>
    %c1_55 = arith.constant 1 : index
    %c0_56 = arith.constant 0 : index
    %60 = vector.load %arg6[%c1_55, %c0_56] : memref<2x512xf32, #tpu.memory_space<vmem>>, vector<1x512xf32>
    %61 = vector.broadcast %60 : vector<1x512xf32> to vector<4x512xf32>
    %62 = arith.mulf %59, %61 : vector<4x512xf32>
    %63 = tpu.concatenate %7, %12, %20, %28, %33, %41, %49, %54, %62 in 0 : vector<4x512xf32>, vector<4x512xf32>, vector<4x512xf32>, vector<4x512xf32>, vector<4x512xf32>, vector<4x512xf32>, vector<4x512xf32>, vector<4x512xf32>, vector<4x512xf32> -> vector<36x512xf32>
    %c0_57 = arith.constant 0 : index
    %c0_58 = arith.constant 0 : index
    %64 = vector.load %arg2[%c0_57, %c0_58] : memref<16x36xf32, #tpu.memory_space<vmem>>, vector<16x36xf32>
    %cst = arith.constant dense<0.000000e+00> : vector<16x512xf32>
    %65 = tpu.matmul %64, %63, %cst {dimension_numbers = #tpu.dot_dimension_numbers<[1], [0], [0], [1], [0, 0, 1, 1], [], []>} : vector<16x36xf32>, vector<36x512xf32>, vector<16x512xf32> -> vector<16x512xf32>
    %c0_59 = arith.constant 0 : index
    %c0_60 = arith.constant 0 : index
    %66 = vector.load %arg3[%c0_59, %c0_60] : memref<16x1xf32, #tpu.memory_space<vmem>>, vector<16x1xf32>
    %67 = vector.broadcast %66 : vector<16x1xf32> to vector<16x512xf32>
    %68 = arith.addf %65, %67 : vector<16x512xf32>
    %cst_61 = arith.constant 0.000000e+00 : f32
    %69 = vector.broadcast %cst_61 : f32 to vector<16x512xf32>
    %70 = arith.maximumf %68, %69 : vector<16x512xf32>
    %c0_62 = arith.constant 0 : index
    %c0_63 = arith.constant 0 : index
    %71 = vector.load %arg4[%c0_62, %c0_63] : memref<4x16xf32, #tpu.memory_space<vmem>>, vector<4x16xf32>
    %cst_64 = arith.constant dense<0.000000e+00> : vector<4x512xf32>
    %72 = tpu.matmul %71, %70, %cst_64 {dimension_numbers = #tpu.dot_dimension_numbers<[1], [0], [0], [1], [0, 0, 1, 1], [], []>} : vector<4x16xf32>, vector<16x512xf32>, vector<4x512xf32> -> vector<4x512xf32>
    %c0_65 = arith.constant 0 : index
    %c0_66 = arith.constant 0 : index
    %73 = vector.load %arg5[%c0_65, %c0_66] : memref<4x1xf32, #tpu.memory_space<vmem>>, vector<4x1xf32>
    %74 = vector.broadcast %73 : vector<4x1xf32> to vector<4x512xf32>
    %75 = arith.addf %72, %74 : vector<4x512xf32>
    %c0_67 = arith.constant 0 : index
    %c0_68 = arith.constant 0 : index
    %c0_69 = arith.constant 0 : index
    %76 = vector.load %arg7[%c0_67, %c0_68, %c0_69] : memref<1x4x512xf32, #tpu.memory_space<vmem>>, vector<1x4x512xf32>
    %77 = vector.shape_cast %76 : vector<1x4x512xf32> to vector<4x512xf32>
    %78 = vector.shape_cast %75 : vector<4x512xf32> to vector<1x4x512xf32>
    tpu.vector_store %arg7[%c0_67, %c0_68, %c0_69], %78 {strides = array<i32>} : memref<1x4x512xf32, #tpu.memory_space<vmem>>, vector<1x4x512xf32>,
    return
  }
  func.func @transform_0(%arg0: i32) -> (i32, i32, i32) {
    %c0_i32 = arith.constant 0 : i32
    %c0_i32_0 = arith.constant 0 : i32
    %c0_i32_1 = arith.constant 0 : i32
    return %arg0, %c0_i32, %c0_i32_0 : i32, i32, i32
  }
  func.func @transform_1(%arg0: i32) -> (i32, i32) {
    %c0_i32 = arith.constant 0 : i32
    %c0_i32_0 = arith.constant 0 : i32
    %c0_i32_1 = arith.constant 0 : i32
    return %c0_i32, %c0_i32_0 : i32, i32
  }
  func.func @transform_2(%arg0: i32) -> (i32, i32) {
    %c0_i32 = arith.constant 0 : i32
    %c0_i32_0 = arith.constant 0 : i32
    %c0_i32_1 = arith.constant 0 : i32
    return %c0_i32, %c0_i32_0 : i32, i32
  }
  func.func @transform_3(%arg0: i32) -> (i32, i32) {
    %c0_i32 = arith.constant 0 : i32
    %c0_i32_0 = arith.constant 0 : i32
    %c0_i32_1 = arith.constant 0 : i32
    return %c0_i32, %c0_i32_0 : i32, i32
  }
  func.func @transform_4(%arg0: i32) -> (i32, i32) {
    %c0_i32 = arith.constant 0 : i32
    %c0_i32_0 = arith.constant 0 : i32
    %c0_i32_1 = arith.constant 0 : i32
    return %c0_i32, %c0_i32_0 : i32, i32
  }
  func.func @transform_5(%arg0: i32) -> (i32, i32) {
    %c0_i32 = arith.constant 0 : i32
    %c0_i32_0 = arith.constant 0 : i32
    %c0_i32_1 = arith.constant 0 : i32
    return %c0_i32, %c0_i32_0 : i32, i32
  }
  func.func @transform_6(%arg0: i32) -> (i32, i32, i32) {
    %c0_i32 = arith.constant 0 : i32
    %c0_i32_0 = arith.constant 0 : i32
    %c0_i32_1 = arith.constant 0 : i32
    return %arg0, %c0_i32, %c0_i32_0 : i32, i32, i32
  }
}

</mosaic_0001>

<bundles_post_ra>
// kernel: tpu_custom_call.1
= control target key start
LH: loop header
LB: loop body
LE: loop exit
PB: predicated region body
PF: predicated region fallthrough
CT: control target
= control target key end

     0   :  { %11 = vsyncpa [#allocation3], 0  ;;  %s1061_s0 = inlined_call_operand.hbm [shape: f32[2,4,384], index: 0, kind: input, shape index: {}]   ;;  %s1062_s1 = inlined_call_operand.vmem [shape: f32[16,36], index: 1, kind: input, shape index: {}]   ;;  %s1063_s2 = inlined_call_operand.vmem [shape: f32[16,1], index: 2, kind: input, shape index: {}]   ;;  %s1064_s3 = inlined_call_operand.hbm [shape: f32[4,16], index: 3, kind: input, shape index: {}]   ;;  %s1065_s4 = inlined_call_operand.vmem [shape: f32[4,1], index: 4, kind: input, shape index: {}]   ;;  %s1066_s5 = inlined_call_operand.vmem [shape: f32[2,512], index: 5, kind: input, shape index: {}]   ;;  %s1067_s6 = inlined_call_operand.hbm [shape: f32[1,4,512], index: 6, kind: output, shape index: {}]  }
   0x1   :  { %12 = vsyncpa [#allocation6], 0 }
   0x2   :  { %13 = vsyncpa [#allocation4], 0  ;;  %s819_s21 = smov [#allocation2]  }
   0x3   :  { %s19_s22 = sshll.u32 %s819_s21, 4  ;;  %s20_s22 = int_to_ptr.vmem [resolvable:$true] %s19_s22 }
   0x4   :  { %s761_s23 = scalar_lea.vmem %s20_s22, 384  ;;  %p766_p1 = scmp.lt.s32.totalorder %s20_s22, %s20_s22 }
   0x5   :  { %p762_p0 = scmp.ne.s32.totalorder %s20_s22, %s761_s23  ;;  %p767_p2 = scmp.lt.s32.totalorder %s761_s23, %s761_s23 }
   0x7   :  { %p768_p3 = por %p767_p2, %p766_p1 }
   0x9   :  { %p769_p4 = pnand %p768_p3, %p762_p0 }
   0xb   :  { %772 = shalt.err (!%p769_p4)
}
   0xc   :  { %s820_s24 = smov 192   ;;  %s821_s25 = smov 12  }
   0xd   :  { %25 = dma.hbm_to_vmem [thread:$0]  %s1061_s0, 384, %s20_s22, [#allocation3], %s820_s24, %s820_s24, %s821_s25  }
   0xe   :  { %s822_s28 = smov [#allocation5]  }
   0xf   :  { %s36_s29 = sshll.u32 %s822_s28, 4  ;;  %s37_s29 = int_to_ptr.vmem [resolvable:$true] %s36_s29 }
  0x10   :  { %s781_s30 = scalar_lea.vmem %s37_s29, 64  ;;  %p786_p6 = scmp.lt.s32.totalorder %s37_s29, %s37_s29 }
  0x11   :  { %p782_p5 = scmp.ne.s32.totalorder %s37_s29, %s781_s30  ;;  %p787_p7 = scmp.lt.s32.totalorder %s781_s30, %s781_s30 }
  0x13   :  { %p788_p8 = por %p787_p7, %p786_p6 }
  0x15   :  { %p789_p9 = pnand %p788_p8, %p782_p5 }
  0x17   :  { %792 = shalt.err (!%p789_p9)
}
  0x18   :  { %39 = dma.hbm_to_vmem [thread:$0]  %s1064_s3, 64, %s37_s29, [#allocation6]  }
  0x19   :  { %813 = dma.done.wait [#allocation3], 384  }
  0x1a   :  { %814 = vsyncadd [#allocation3], 4294966912 }
  0x1b   :  { %815 = dma.done.wait [#allocation6], 64  }
  0x1c   :  { %816 = vsyncadd [#allocation6], 4294967232  ;;  %v86_v0 = vld [vmem:[#allocation2 + $0x14] sm:$0xf]  ;;  %v85_v1 = vld [vmem:[#allocation2 + $0x8] sm:$0xf]  ;;  %v61_v11 = vlaneseq }
  0x1d   :  { %v875_v2 = vld [vmem:[#allocation2] sm:$0xff]  ;;  %s823_s0 = smov 94   ;;  %v881_v4 = vld [vmem:[#allocation2 + $0xc] sm:$0xff]  ;;  %s824_s9 = smov 110   ;;  %v830_v6 = vmov 0.0   ;;  %v832_v7 = vmov 0  }
  0x1e   :  { %282 = vrot.lane.b32.xlu1 %v86_v0, %s823_s0  ;;  %271 = vrot.lane.b32.xlu0 %v85_v1, %s823_s0  ;;  %v879_v3 = vcombine.high %v875_v2, %v875_v2  ;;  %v886_v5 = vcombine.high %v881_v4, %v881_v4  ;;  %s825_s3 = smov 96   ;;  %s826_s10 = smov 95   ;;  %v351_v8 = vld [vmem:[%s1063_s2] sm:$0xff]  ;;  %v352_v9 = vld [vmem:[%s1063_s2 + $0x8] sm:$0xff]  ;;  %v930_v12 = vshrl.u32 %v61_v11, 7  ;;  %vm273_vm0 = vcmask 769024  }
  0x1f   :  { %s827_s11 = smov 112   ;;  %s828_s12 = smov 126   ;;  %446 = vmatprep.mubr.f32.mxu0 %v830_v6  ;;  %523 = vmatprep.mubr.f32.mxu1 %v830_v6  ;;  %v545_v10 = vld [vmem:[%s1065_s4] sm:$0xf]  ;;  %vm332_vm1 = vcmask 1043456   ;;  %vm256_vm2 = vcmask 777216  }
  0x20   :  { %s829_s13 = smov 111   ;;  %s831_s14 = smov 127   ;;  %750 = vset.pattern.permute.xlu1 %v832_v7  ;;  %749 = vset.pattern.permute.xlu0 %v832_v7  ;;  %v67_v13 = vsub.s32 1, %v930_v12  ;;  %v723_v14 = vld [vmem:[%s1066_s5 + $0x1] ss:$2 sm:$0xf] }
  0x21   :  { %v75_v18 = vsub.s32 3, %v930_v12  ;;  %v71_v36 = vsub.s32 2, %v930_v12  ;;  %v63_v37 = vsub.s32 0, %v930_v12  ;;  %v59_v38 = vld [vmem:[%s1066_s5] ss:$2 sm:$0xf] }
  0x22   :  { %204 = vrot.lane.b32.xlu1 %v85_v1, %s824_s9  ;;  %269 = vrot.lane.b32.xlu0 %v879_v3, %s823_s0  ;;  %v936_v17 = vrot.slane %v723_v14, %v67_v13  ;;  %vm231_vm3 = vcmask 785408   ;;  %v962_v43 = vrot.slane %v59_v38, %v67_v13  ;;  %vm206_vm4 = vcmask 900096  }
  0x23   :  { %v943_v23 = vrot.slane %v723_v14, %v75_v18  ;;  %v964_v44 = vrot.slane %v59_v38, %v75_v18  ;;  %v966_v45 = vrot.slane %v723_v14, %v71_v36  ;;  %v968_v46 = vrot.slane %v723_v14, %v63_v37 }
  0x24   :  { %v984_v7 = vrot.slane %v59_v38, %v63_v37  ;;  %vm185_vm5 = vcmask 908288   ;;  %vm160_vm6 = vcmask 916480   ;;  %vm112_vm7 = vcmask 1031168  }
  0x25   :  { %vm94_vm8 = vcmask 1039360   ;;  %vm363_vm9 = vcmask 293888   ;;  %vm551_vm10 = vcmask 130048  }
  0x26   :  { %280 = vrot.lane.b32.xlu1 %v886_v5, %s823_s0  ;;  %202 = vrot.lane.b32.xlu0 %v879_v3, %s824_s9 }
  0x2a   :  { %215 = vrot.lane.b32.xlu1 %v86_v0, %s824_s9  ;;  %213 = vrot.lane.b32.xlu0 %v886_v5, %s824_s9 }
  0x2e   :  { %229 = vrot.lane.b32.xlu1 %v85_v1, %s825_s3  ;;  %227 = vrot.lane.b32.xlu0 %v879_v3, %s825_s3 }
  0x32   :  { %240 = vrot.lane.b32.xlu1 %v86_v0, %s825_s3  ;;  %238 = vrot.lane.b32.xlu0 %v886_v5, %s825_s3 }
  0x36   :  { %254 = vrot.lane.b32.xlu1 %v85_v1, %s826_s10  ;;  %252 = vrot.lane.b32.xlu0 %v879_v3, %s826_s10 }
  0x3a   :  { %263 = vrot.lane.b32.xlu1 %v86_v0, %s826_s10  ;;  %261 = vrot.lane.b32.xlu0 %v886_v5, %s826_s10 }
  0x3e   :  { %278 = vrot.lane.b32.xlu1 %v881_v4, %s823_s0  ;;  %267 = vrot.lane.b32.xlu0 %v875_v2, %s823_s0 }
  0x42   :  { %211 = vrot.lane.b32.xlu1 %v881_v4, %s824_s9  ;;  %200 = vrot.lane.b32.xlu0 %v875_v2, %s824_s9 }
  0x46   :  { %236 = vrot.lane.b32.xlu1 %v881_v4, %s825_s3  ;;  %225 = vrot.lane.b32.xlu0 %v875_v2, %s825_s3 }
  0x4a   :  { %259 = vrot.lane.b32.xlu1 %v881_v4, %s826_s10  ;;  %250 = vrot.lane.b32.xlu0 %v875_v2, %s826_s10 }
  0x4e   :  { %158 = vrot.lane.b32.xlu1 %v85_v1, %s827_s11  ;;  %156 = vrot.lane.b32.xlu0 %v879_v3, %s827_s11 }
  0x52   :  { %169 = vrot.lane.b32.xlu1 %v86_v0, %s827_s11  ;;  %167 = vrot.lane.b32.xlu0 %v886_v5, %s827_s11 }
  0x56   :  { %165 = vrot.lane.b32.xlu1 %v881_v4, %s827_s11  ;;  %154 = vrot.lane.b32.xlu0 %v875_v2, %s827_s11 }
  0x5a   :  { %110 = vrot.lane.b32.xlu1 %v85_v1, %s828_s12  ;;  %108 = vrot.lane.b32.xlu0 %v879_v3, %s828_s12 }
  0x5e   :  { %121 = vrot.lane.b32.xlu1 %v86_v0, %s828_s12  ;;  %119 = vrot.lane.b32.xlu0 %v886_v5, %s828_s12 }
  0x62   :  { %183 = vrot.lane.b32.xlu1 %v85_v1, %s829_s13  ;;  %181 = vrot.lane.b32.xlu0 %v879_v3, %s829_s13 }
  0x66   :  { %194 = vrot.lane.b32.xlu1 %v86_v0, %s829_s13  ;;  %192 = vrot.lane.b32.xlu0 %v886_v5, %s829_s13 }
  0x6a   :  { %117 = vrot.lane.b32.xlu1 %v881_v4, %s828_s12  ;;  %106 = vrot.lane.b32.xlu0 %v875_v2, %s828_s12 }
  0x6e   :  { %190 = vrot.lane.b32.xlu1 %v881_v4, %s829_s13  ;;  %179 = vrot.lane.b32.xlu0 %v875_v2, %s829_s13 }
  0x72   :  { %92 = vrot.lane.b32.xlu1 %v85_v1, %s831_s14  ;;  %90 = vrot.lane.b32.xlu0 %v879_v3, %s831_s14  ;;  %v982_v1 = vrot.slane %v59_v38, %v71_v36 }
  0x76   :  { %102 = vrot.lane.b32.xlu1 %v86_v0, %s831_s14  ;;  %100 = vrot.lane.b32.xlu0 %v886_v5, %s831_s14 }
  0x7a   :  { %98 = vrot.lane.b32.xlu1 %v881_v4, %s831_s14  ;;  %88 = vrot.lane.b32.xlu0 %v875_v2, %s831_s14 }
  0x7e   :  { %355 = vperm.xlu1 %750, %v351_v8   ;;  %360 = vperm.xlu0 %749, %v352_v9  }
  0x82   :  { %548 = vperm.xlu1 %750, %v545_v10  }
  0x90   :  { %v283_v15 = vpop.permute.xlu1 %282  ;;  %v272_v16 = vpop.permute.xlu0 %271 }
  0x94   :  { %v939_v19 = vpop.permute.xlu1 %204  ;;  %v270_v20 = vpop.permute.xlu0 %269 }
  0x95   :  { %v275_v21 = vsel %vm273_vm0, %v270_v20, %v272_v16 }
  0x96   :  { %v289_v22 = vmul.f32 %v275_v21, %v936_v17 }
  0x98   :  { %v281_v24 = vpop.permute.xlu1 %280  ;;  %724 = vmatprep.subr.msk.mxu0 %vm332_vm1, %v289_v22  ;;  %v946_v25 = vpop.permute.xlu0 %202 }
  0x99   :  { %v285_v26 = vsel %vm273_vm0, %v281_v24, %v283_v15 }
  0x9a   :  { %v291_v27 = vmul.f32 %v285_v26, %v943_v23 }
  0x9c   :  { %728 = vmatprep.subr.msk.mxu1 %vm332_vm1, %v291_v27  ;;  %v951_v28 = vpop.permute.xlu1 %215  ;;  %v953_v29 = vpop.permute.xlu0 %213 }
  0x9d   :  { %v218_v38 = vsel %vm206_vm4, %v953_v29, %v951_v28 }
  0xa0   :  { %v230_v30 = vpop.permute.xlu1 %229  ;;  %v228_v31 = vpop.permute.xlu0 %227 }
  0xa1   :  { %v233_v47 = vsel %vm231_vm3, %v228_v31, %v230_v30 }
  0xa2   :  { %v247_v55 = vmul.f32 %v233_v47, %v962_v43 }
  0xa4   :  { %v241_v32 = vpop.permute.xlu1 %240  ;;  %v239_v33 = vpop.permute.xlu0 %238 }
  0xa5   :  { %v243_v48 = vsel %vm231_vm3, %v239_v33, %v241_v32 }
  0xa6   :  { %v249_v56 = vmul.f32 %v243_v48, %v964_v44 }
  0xa8   :  { %v255_v34 = vpop.permute.xlu1 %254  ;;  %v253_v35 = vpop.permute.xlu0 %252 }
  0xa9   :  { %v258_v41 = vsel %vm256_vm2, %v253_v35, %v255_v34  ;;  %v208_v34 = vsel %vm206_vm4, %v946_v25, %v939_v19 }
  0xaa   :  { %v325_v49 = vrot.slane %v258_v41, 4 }
  0xac   :  { %v264_v39 = vpop.permute.xlu1 %263  ;;  %v262_v40 = vpop.permute.xlu0 %261  ;;  %v346_v61 = vsel %vm332_vm1, %v247_v55, %v325_v49 }
  0xad   :  { %v266_v42 = vsel %vm256_vm2, %v262_v40, %v264_v39 }
  0xae   :  { %v327_v50 = vrot.slane %v266_v42, 4 }
  0xb0   :  { %v279_v51 = vpop.permute.xlu1 %278  ;;  %v268_v52 = vpop.permute.xlu0 %267  ;;  %v348_v62 = vsel %vm332_vm1, %v249_v56, %v327_v50 }
  0xb1   :  { %v284_v53 = vsel %vm273_vm0, %v279_v51, %v281_v24  ;;  %v274_v54 = vsel %vm273_vm0, %v268_v52, %v270_v20 }
  0xb2   :  { %v290_v57 = vmul.f32 %v284_v53, %v966_v45  ;;  %v288_v58 = vmul.f32 %v274_v54, %v968_v46 }
  0xb4   :  { %729 = vmatpush1.msk.msra.mxu1 %vm332_vm1, %v290_v57  ;;  %v212_v59 = vpop.permute.xlu1 %211  ;;  %725 = vmatpush1.msk.msra.mxu0 %vm332_vm1, %v288_v58  ;;  %v201_v60 = vpop.permute.xlu0 %200 }
  0xb5   :  { %406 = vmatprep.subr.mxu0 %v346_v61  ;;  %483 = vmatprep.subr.mxu1 %v348_v62  ;;  %v217_v51 = vsel %vm206_vm4, %v212_v59, %v953_v29  ;;  %v207_v28 = vsel %vm206_vm4, %v201_v60, %v946_v25 }
  0xb6   :  { %v223_v58 = vmul.f32 %v217_v51, %v966_v45  ;;  %v221_v61 = vmul.f32 %v207_v28, %v968_v46  ;;  %v349_v28 = vld [vmem:[%s1062_s1] sm:$0xff] }
  0xb8   :  { %v237_v63 = vpop.permute.xlu1 %236  ;;  %v226_v0 = vpop.permute.xlu0 %225 }
  0xb9   :  { %v242_v8 = vsel %vm231_vm3, %v237_v63, %v239_v33  ;;  %v232_v9 = vsel %vm231_vm3, %v226_v0, %v228_v31 }
  0xba   :  { %v248_v14 = vmul.f32 %v242_v8, %v982_v1  ;;  %v246_v15 = vmul.f32 %v232_v9, %v984_v7 }
  0xbc   :  { %v260_v10 = vpop.permute.xlu1 %259  ;;  %v251_v11 = vpop.permute.xlu0 %250 }
  0xbd   :  { %v265_v12 = vsel %vm256_vm2, %v260_v10, %v262_v40  ;;  %v257_v13 = vsel %vm256_vm2, %v251_v11, %v253_v35  ;;  %v222_v35 = vmul.f32 %v208_v34, %v936_v17  ;;  %v224_v40 = vmul.f32 %v218_v38, %v943_v23 }
  0xbe   :  { %v326_v16 = vrot.slane %v265_v12, 4  ;;  %v324_v18 = vrot.slane %v257_v13, 4  ;;  %v318_v13 = vrot.slane %v223_v58, 4 }
  0xbf   :  { %v317_v39 = vrot.slane %v222_v35, 4  ;;  %v319_v19 = vrot.slane %v224_v40, 4  ;;  %v82_v35 = vmul.f32 %v962_v43, %v879_v3 }
  0xc0   :  { %v159_v20 = vpop.permute.xlu1 %158  ;;  %v157_v21 = vpop.permute.xlu0 %156  ;;  %v345_v22 = vsel %vm332_vm1, %v246_v15, %v324_v18  ;;  %v347_v24 = vsel %vm332_vm1, %v248_v14, %v326_v16  ;;  %v316_v14 = vrot.slane %v221_v61, 4 }
  0xc1   :  { %407 = vmatpush1.msra.mxu0 %v345_v22  ;;  %484 = vmatpush1.msra.mxu1 %v347_v24  ;;  %v162_v53 = vsel %vm160_vm6, %v157_v21, %v159_v20 }
  0xc2   :  { %v176_v60 = vmul.f32 %v162_v53, %v962_v43  ;;  %v81_v43 = vmul.f32 %v984_v7, %v875_v2  ;;  %v350_v2 = vld [vmem:[%s1062_s1 + $0x8] sm:$0xff]  ;;  %s833_s1 = smov [#allocation7]  }
  0xc3   :  { %s713_s26 = sshll.u32 %s833_s1, 4  ;;  %s714_s26 = int_to_ptr.vmem [resolvable:$true] %s713_s26 }
  0xc4   :  { %v170_v26 = vpop.permute.xlu1 %169  ;;  %v168_v27 = vpop.permute.xlu0 %167  ;;  %s793_s27 = scalar_lea.vmem %s714_s26, 256  ;;  %p798_p11 = scmp.lt.s32.totalorder %s714_s26, %s714_s26 }
  0xc5   :  { %v172_v54 = vsel %vm160_vm6, %v168_v27, %v170_v26  ;;  %p794_p10 = scmp.ne.s32.totalorder %s714_s26, %s793_s27  ;;  %p799_p12 = scmp.lt.s32.totalorder %s793_s27, %s793_s27 }
  0xc6   :  { %v178_v63 = vmul.f32 %v172_v54, %v964_v44 }
  0xc7   :  { %p800_p13 = por %p799_p12, %p798_p11 }
  0xc8   :  { %v166_v30 = vpop.permute.xlu1 %165  ;;  %v155_v31 = vpop.permute.xlu0 %154  ;;  %v307_v22 = vrot.slane %v178_v63, 4 }
  0xc9   :  { %v171_v56 = vsel %vm160_vm6, %v166_v30, %v168_v27  ;;  %v161_v57 = vsel %vm160_vm6, %v155_v31, %v157_v21  ;;  %v305_v21 = vrot.slane %v176_v60, 4  ;;  %p801_p0 = pnand %p800_p13, %p794_p10 }
  0xca   :  { %v177_v9 = vmul.f32 %v171_v56, %v982_v1  ;;  %v175_v10 = vmul.f32 %v161_v57, %v984_v7 }
  0xcc   :  { %v111_v32 = vpop.permute.xlu1 %110  ;;  %v109_v33 = vpop.permute.xlu0 %108  ;;  %v306_v27 = vrot.slane %v177_v9, 4  ;;  %v304_v30 = vrot.slane %v175_v10, 4 }
  0xcd   :  { %v114_v62 = vsel %vm112_vm7, %v109_v33, %v111_v32 }
  0xce   :  { %v151_v11 = vmul.f32 %v936_v17, %v114_v62 }
  0xd0   :  { %v122_v36 = vpop.permute.xlu1 %121  ;;  %v120_v37 = vpop.permute.xlu0 %119 }
  0xd1   :  { %v124_v29 = vsel %vm112_vm7, %v120_v37, %v122_v36 }
  0xd2   :  { %v153_v12 = vmul.f32 %v943_v23, %v124_v29 }
  0xd4   :  { %v184_v41 = vpop.permute.xlu1 %183  ;;  %v182_v42 = vpop.permute.xlu0 %181 }
  0xd5   :  { %v187_v47 = vsel %vm185_vm5, %v182_v42, %v184_v41  ;;  %v84_v41 = vmul.f32 %v964_v44, %v886_v5 }
  0xd6   :  { %v342_v48 = vsel %vm332_vm1, %v187_v47, %v317_v39 }
  0xd7   :  { %408 = vmatprep.subr.mxu0 %v342_v48 }
  0xd8   :  { %v195_v49 = vpop.permute.xlu1 %194  ;;  %v193_v50 = vpop.permute.xlu0 %192 }
  0xd9   :  { %v197_v52 = vsel %vm185_vm5, %v193_v50, %v195_v49  ;;  %v83_v49 = vmul.f32 %v982_v1, %v881_v4 }
  0xda   :  { %v344_v55 = vsel %vm332_vm1, %v197_v52, %v319_v19 }
  0xdb   :  { %485 = vmatprep.subr.mxu1 %v344_v55 }
  0xdc   :  { %v118_v59 = vpop.permute.xlu1 %117  ;;  %v107_v25 = vpop.permute.xlu0 %106 }
  0xdd   :  { %v123_v0 = vsel %vm112_vm7, %v118_v59, %v120_v37  ;;  %v113_v8 = vsel %vm112_vm7, %v107_v25, %v109_v33 }
  0xde   :  { %v152_v15 = vmul.f32 %v966_v45, %v123_v0  ;;  %v150_v16 = vmul.f32 %v968_v46, %v113_v8  ;;  %v338_v45 = vsel %vm332_vm1, %v151_v11, %v305_v21  ;;  %v340_v46 = vsel %vm332_vm1, %v153_v12, %v307_v22 }
  0xe0   :  { %v191_v18 = vpop.permute.xlu1 %190  ;;  %v180_v20 = vpop.permute.xlu0 %179  ;;  %v337_v33 = vsel %vm332_vm1, %v150_v16, %v304_v30  ;;  %v339_v34 = vsel %vm332_vm1, %v152_v15, %v306_v27 }
  0xe1   :  { %v196_v24 = vsel %vm185_vm5, %v191_v18, %v193_v50  ;;  %v186_v26 = vsel %vm185_vm5, %v180_v20, %v182_v42  ;;  %v544_v18 = vld [vmem:[#allocation5] sm:$0xf] }
  0xe2   :  { %v341_v17 = vsel %vm332_vm1, %v186_v26, %v316_v14  ;;  %v343_v23 = vsel %vm332_vm1, %v196_v24, %v318_v13 }
  0xe3   :  { %409 = vmatpush1.msra.mxu0 %v341_v17  ;;  %486 = vmatpush1.msra.mxu1 %v343_v23 }
  0xe4   :  { %v93_v31 = vpop.permute.xlu1 %92  ;;  %410 = vmatprep.subr.mxu0 %v338_v45  ;;  %487 = vmatprep.subr.mxu1 %v340_v46  ;;  %v91_v32 = vpop.permute.xlu0 %90 }
  0xe5   :  { %v96_v36 = vsel %vm94_vm8, %v91_v32, %v93_v31  ;;  %411 = vmatpush1.msra.mxu0 %v337_v33  ;;  %488 = vmatpush1.msra.mxu1 %v339_v34 }
  0xe6   :  { %v293_v37 = vrot.slane %v96_v36, 4 }
  0xe8   :  { %v103_v38 = vpop.permute.xlu1 %102  ;;  %v101_v39 = vpop.permute.xlu0 %100  ;;  %v334_v40 = vsel %vm332_vm1, %v82_v35, %v293_v37 }
  0xe9   :  { %v105_v42 = vsel %vm94_vm8, %v101_v39, %v103_v38  ;;  %412 = vmatprep.subr.mxu0 %v334_v40 }
  0xea   :  { %v295_v47 = vrot.slane %v105_v42, 4 }
  0xec   :  { %v99_v48 = vpop.permute.xlu1 %98  ;;  %v89_v19 = vpop.permute.xlu0 %88  ;;  %v336_v3 = vsel %vm332_vm1, %v84_v41, %v295_v47 }
  0xed   :  { %v104_v50 = vsel %vm94_vm8, %v99_v48, %v101_v39  ;;  %v95_v51 = vsel %vm94_vm8, %v89_v19, %v91_v32  ;;  %489 = vmatprep.subr.mxu1 %v336_v3 }
  0xee   :  { %v294_v5 = vrot.slane %v104_v50, 4  ;;  %v292_v44 = vrot.slane %v95_v51, 4 }
  0xf0   :  { %v333_v52 = vsel %vm332_vm1, %v81_v43, %v292_v44  ;;  %v335_v53 = vsel %vm332_vm1, %v83_v49, %v294_v5 }
  0xf1   :  { %413 = vmatpush1.msra.mxu0 %v333_v52  ;;  %490 = vmatpush1.msra.mxu1 %v335_v53 }
  0xf2   :  { %726 = vmatmul.mubr.msk.f32.vlgmr.msra.gmra.mxu0 %vm363_vm9, %v349_v28  ;;  %730 = vmatmul.mubr.msk.f32.vlgmr.msra.gmra.mxu1 %vm363_vm9, %v349_v28 }
  0xf3   :  { %452 = vmatprep.mubr.f32.mxu0 %v830_v6  ;;  %529 = vmatprep.mubr.f32.mxu1 %v830_v6 }
  0xf6   :  { %727 = vmatmul.mubr.msk.f32.gmra.mxu0 %vm363_vm9, %v350_v2  ;;  %731 = vmatmul.mubr.msk.f32.gmra.mxu1 %vm363_vm9, %v350_v2 }
  0xf7   :  { %619 = vmatprep.mubr.f32.mxu0 %v830_v6  ;;  %690 = vmatprep.mubr.f32.mxu1 %v830_v6 }
  0xf9   :  { %v361_v55 = vpop.permute.xlu0 %360  ;;  %v356_v58 = vpop.permute.xlu1 %355 }
  0xfd   :  { %v549_v22 = vpop.permute.xlu1 %548 }
 0x1b2   :  { %v448_v4 = vpop.f32.mrf.mxu0  ;;  %v525_v1 = vpop.f32.mrf.mxu1 }
 0x1b3   :  { %v449_v8 = vadd.f32 %v448_v4, %v356_v58  ;;  %v526_v9 = vadd.f32 %v525_v1, %v356_v58 }
 0x1b4   :  { %v450_v7 = vpop.f32.mrf.mxu0  ;;  %v527_v54 = vpop.f32.mrf.mxu1 }
 0x1b5   :  { %v451_v25 = vadd.f32 %v450_v7, %v356_v58  ;;  %v528_v60 = vadd.f32 %v527_v54, %v356_v58  ;;  %v536_v15 = vmax.f32 %v449_v8, 0.0  ;;  %v538_v16 = vmax.f32 %v526_v9, 0.0 }
 0x1b6   :  { %v531_v56 = vpop.f32.mrf.mxu1  ;;  %v454_v57 = vpop.f32.mrf.mxu0 }
 0x1b7   :  { %v532_v61 = vadd.f32 %v531_v56, %v361_v55  ;;  %v455_v62 = vadd.f32 %v454_v57, %v361_v55  ;;  %v537_v13 = vmax.f32 %v451_v25, 0.0  ;;  %v539_v14 = vmax.f32 %v528_v60, 0.0 }
 0x1b8   :  { %v456_v29 = vpop.f32.mrf.mxu0  ;;  %v533_v59 = vpop.f32.mrf.mxu1 }
 0x1b9   :  { %v457_v63 = vadd.f32 %v456_v29, %v361_v55  ;;  %v534_v0 = vadd.f32 %v533_v59, %v361_v55  ;;  %v542_v11 = vmax.f32 %v532_v61, 0.0  ;;  %v540_v12 = vmax.f32 %v455_v62, 0.0 }
 0x1bb   :  { %v541_v10 = vmax.f32 %v457_v63, 0.0  ;;  %v543_v6 = vmax.f32 %v534_v0, 0.0 }
 0x1bd   :  { %583 = vmatprep.subr.mxu0 %v541_v10  ;;  %654 = vmatprep.subr.mxu1 %v543_v6 }
 0x1be   :  { %584 = vmatpush1.msra.mxu0 %v540_v12  ;;  %655 = vmatpush1.msra.mxu1 %v542_v11 }
 0x1bf   :  { %585 = vmatprep.subr.mxu0 %v537_v13  ;;  %656 = vmatprep.subr.mxu1 %v539_v14 }
 0x1c0   :  { %586 = vmatpush1.msra.mxu0 %v536_v15  ;;  %657 = vmatpush1.msra.mxu1 %v538_v16 }
 0x1c1   :  { %732 = vmatmul.mubr.msk.f32.vlgmr.msra.gmra.mxu0 %vm551_vm10, %v544_v18  ;;  %733 = vmatmul.mubr.msk.f32.vlgmr.msra.gmra.mxu1 %vm551_vm10, %v544_v18 }
 0x281   :  { %v621_v20 = vpop.f32.mrf.mxu0  ;;  %v692_v21 = vpop.f32.mrf.mxu1 }
 0x282   :  { %v622_v27 = vadd.f32 %v621_v20, %v549_v22  ;;  %v693_v30 = vadd.f32 %v692_v21, %v549_v22 }
 0x283   :  { %v623_v24 = vpop.f32.mrf.mxu0  ;;  %v694_v26 = vpop.f32.mrf.mxu1 }
 0x284   :  { %v624_v17 = vadd.f32 %v623_v24, %v549_v22  ;;  %v695_v23 = vadd.f32 %v694_v26, %v549_v22 }
 0x286   :  { %v701_v45 = vcombine.low %v622_v27, %v624_v17  ;;  %v702_v46 = vcombine.low %v693_v30, %v695_v23 }
 0x288   :  { %705 = vst [vmem:[#allocation7] sm:$0xff] %v701_v45  ;;  %706 = vst [vmem:[#allocation7 + $0x8] sm:$0xff] %v702_v46 }
 0x289   :  { %804 = shalt.err (!%p801_p0)
}
 0x28a   :  { %716 = dma.vmem_to_hbm [thread:$0]  %s714_s26, 256, %s1067_s6, [#allocation4]  }
 0x28b   :  { %817 = dma.done.wait [#allocation4], 256  }
 0x28c   :  { %818 = vsyncadd [#allocation4], 4294967040 }
 0x28d   :  { %720 = vsyncpa [#allocation3], 1 }
 0x28e   :  { %721 = vsyncpa [#allocation6], 1 }
 0x28f   :  { %722 = vsyncpa [#allocation4], 1 }

</bundles_post_ra>
